<compile_context>
chip_gen: v7x
topology: tpu7x:2x2x1
jax: 0.10.0
libtpu: 0.0.40
codegen_flags: <defaults>
</compile_context>

<pallas_src>
import functools
import math

import jax
import jax.numpy as jnp
from jax.experimental import pallas as pl
from jax.experimental.pallas import tpu as pltpu

_EPS = 1e-6
_K_FEAT = 14        # real feature dim of the KLD factorization
_K_PAD = 16         # padded contraction dim (full-array block => legal non-128 last dim)
_TM_MAX = 512       # sublane tile cap
_TN_MAX = 2048      # lane tile cap (multiple of 128: unmasked lane-dense stores)


def _round_up(x, m):
    return ((x + m - 1) // m) * m


def _choose_tile(n, align, cap):
    """Largest balanced tile <= cap: evenly splits the (aligned) extent, minimal padding."""
    n_aligned = _round_up(max(int(n), 1), align)
    if n_aligned <= cap:
        return n_aligned
    num_tiles = -(-n_aligned // cap)                     # ceil(n_aligned / cap)
    return _round_up(-(-n_aligned // num_tiles), align)  # ceil(n_aligned / num_tiles), aligned


# ----------------------------- Pallas kernel (hot path) -----------------------------
def _kld_loss_kernel(fa_ref, fbt_ref, o_ref, *, const):
    # kld[i, j] = FA[i, :] . FB[j, :]  (feature factorization of the Kent KLD matrix)
    kld = jnp.dot(fa_ref[...], fbt_ref[...], preferred_element_type=jnp.float32)
    # Guard tiny negative values from floating-point cancellation so sqrt never NaNs.
    kld = jnp.maximum(kld, 0.0)
    # loss = 1 - 1 / (const + sqrt(kld + eps)); divide on the EUP slot (approx recip).
    o_ref[...] = 1.0 - pl.reciprocal(const + jnp.sqrt(kld + _EPS), approx=True)


def _pairwise_kent_loss_pallas(fa_pad, fbt_pad, tm, tn, const):
    na_pad, k = fa_pad.shape
    nb_pad = fbt_pad.shape[1]
    grid = (na_pad // tm, nb_pad // tn)
    flops = int(2 * na_pad * nb_pad * k + 4 * na_pad * nb_pad)
    bytes_accessed = int(4 * (na_pad * k + k * nb_pad + na_pad * nb_pad))
    kernel = functools.partial(_kld_loss_kernel, const=float(const))
    return pl.pallas_call(
        kernel,
        out_shape=jax.ShapeDtypeStruct((na_pad, nb_pad), jnp.float32),
        grid_spec=pltpu.PrefetchScalarGridSpec(
            num_scalar_prefetch=0,
            grid=grid,
            in_specs=[
                # (TM, 16): last dim equals the full array dim -> legal non-128 block;
                # block index constant over the fast j axis -> not re-fetched.
                pl.BlockSpec((tm, k), lambda i, j: (i, 0)),
                # (16, TN): second-to-last dim equals the full array dim; tiny vs output.
                pl.BlockSpec((k, tn), lambda i, j: (0, j)),
            ],
            out_specs=pl.BlockSpec((tm, tn), lambda i, j: (i, j)),
        ),
        compiler_params=pltpu.CompilerParams(
            dimension_semantics=("parallel", "parallel"),
            vmem_limit_bytes=32 * 1024 * 1024),
        cost_estimate=pl.CostEstimate(
            flops=flops,
            transcendentals=int(2 * na_pad * nb_pad),
            bytes_accessed=bytes_accessed),
    )(fa_pad, fbt_pad)


# ----------------------------- JAX glue (parameter setup) ---------------------------
def deg2kent_single(boxes_deg, img_h, img_w):
    # TODO(synk): original deg2kent_single (spherical-box MLE fit) is external to the module;
    # deterministic analytic proxy with identical output layout (eta, alpha, psi, kappa, beta).
    d2r = jnp.float32(math.pi / 180.0)
    cx, cy, fw, fh = (boxes_deg[:, 0], boxes_deg[:, 1], boxes_deg[:, 2], boxes_deg[:, 3])
    eta = cx * d2r
    alpha = cy * d2r + jnp.float32(math.pi / 2.0)     # colatitude
    psi = jnp.zeros_like(eta)
    w = jnp.maximum(fw * d2r, 1e-3)
    h = jnp.maximum(fh * d2r, 1e-3)
    inv_vu = 1.0 / ((w * 0.5) ** 2)
    inv_vv = 1.0 / ((h * 0.5) ** 2)
    kappa = 0.5 * (inv_vu + inv_vv)
    beta = 0.25 * jnp.abs(inv_vv - inv_vu)
    return jnp.stack([eta, alpha, psi, kappa, beta], axis=-1).astype(jnp.float32)


def soft_clamp_kent_dist(kd, kappa_min=10.0, kappa_max=50.0, beta_max=23.0, temperature=1.0):
    eta, alpha, psi, kappa, beta = (kd[:, 0], kd[:, 1], kd[:, 2], kd[:, 3], kd[:, 4])
    kappa_range = kappa_max - kappa_min
    kappa_c = kappa_min + kappa_range * jax.nn.sigmoid((kappa - kappa_min) / temperature)
    max_beta = jnp.minimum(0.45 * kappa_c, jnp.full_like(kappa_c, beta_max))
    beta_c = max_beta * jax.nn.sigmoid(beta / temperature)
    return jnp.stack([eta, alpha, psi, kappa_c, beta_c], axis=-1)


def radians_to_Q(psi, alpha, eta):
    ca, sa = jnp.cos(alpha), jnp.sin(alpha)
    ce, se = jnp.cos(eta), jnp.sin(eta)
    cp, sp = jnp.cos(psi), jnp.sin(psi)
    g1 = jnp.stack([ca, sa * ce, sa * se], axis=1)
    g2 = jnp.stack([-cp * sa, cp * ca * ce - sp * se, cp * ca * se + sp * ce], axis=1)
    g3 = jnp.stack([sp * sa, -sp * ca * ce - cp * se, -sp * ca * se + cp * ce], axis=1)
    return jnp.stack([g1, g2, g3], axis=2)   # (N, 3, 3): columns are gamma_1, gamma_2, gamma_3


# exp(kappa)-factored versions of approximate_c / del_kappa / del_2_kappa / del_beta.
# Every ratio used below (lambdas, c_k/c) is exp(kappa)-invariant, so factoring it out is
# exact math with far better f32 precision (no ~e^50-scale intermediates).
def _c_scaled(kappa, beta):
    product = (kappa - 2.0 * beta) * (kappa + 2.0 * beta) + _EPS
    return 2.0 * jnp.pi / jnp.sqrt(product)


def _log_c(kappa, beta):
    # log(approximate_c) = kappa + log(2*pi) - 0.5*log((k-2b)(k+2b) + eps)
    product = (kappa - 2.0 * beta) * (kappa + 2.0 * beta) + _EPS
    return kappa + jnp.float32(math.log(2.0 * math.pi)) - 0.5 * jnp.log(product)


def _del_kappa_scaled(kappa, beta):
    num = -2.0 * jnp.pi * (4.0 * beta ** 2 + kappa - kappa ** 2)
    den = (kappa - 2.0 * beta) ** 1.5 * (kappa + 2.0 * beta) ** 1.5 + _EPS
    return num / den


def _del_2_kappa_scaled(kappa, beta):
    num = 2.0 * jnp.pi * (kappa ** 4 - 2.0 * kappa ** 3 + (2.0 - 8.0 * beta ** 2) * kappa ** 2
                          + 8.0 * beta ** 2 * kappa + 16.0 * beta ** 4 + 4.0 * beta ** 2)
    den = (kappa - 2.0 * beta) ** 2.5 * (kappa + 2.0 * beta) ** 2.5 + _EPS
    return num / den


def _del_beta_scaled(kappa, beta):
    num = 8.0 * jnp.pi * beta
    den = (kappa - 2.0 * beta) ** 1.5 * (kappa + 2.0 * beta) ** 1.5 + _EPS
    return num / den


def _expected_moments(kappa, beta, Q):
    """E[x] and E[xx^T] using exp(kappa)-scaled normalizer derivatives."""
    c_t = _c_scaled(kappa, beta)
    c_k_t = _del_kappa_scaled(kappa, beta)
    c_kk_t = _del_2_kappa_scaled(kappa, beta)
    c_b_t = _del_beta_scaled(kappa, beta)
    lam1 = c_k_t / c_t
    lam2 = (c_t - c_kk_t + c_b_t) / (2.0 * c_t + _EPS)
    lam3 = (c_t - c_kk_t - c_b_t) / (2.0 * c_t + _EPS)
    lam = jnp.stack([lam1, lam2, lam3], axis=-1)                  # (N, 3)
    ExxT = jnp.einsum('nk,npk,nqk->npq', lam, Q, Q)               # Q diag(lam) Q^T
    Ex = (c_k_t / (c_t + _EPS))[:, None] * Q[:, :, 0]
    return Ex, ExxT


def _kent_features(pred_c, tgt_c):
    """Factorize the KLD matrix as FA @ FB^T (feature dim 14).

    kld[i,j] = (log c_b[j] - log c_a[i])
             + (kappa_a[i]*g_a1[i] - kappa_b[j]*g_b1[j]) . Ex_a[i]
             + beta_a[i]*g_a2 E_i g_a2  - beta_b[j]*g_b2 E_i g_b2
             - beta_a[i]*g_a3 E_i g_a3  + beta_b[j]*g_b3 E_i g_b3
    """
    # --- A side (pred) ---
    eta_a, alpha_a, psi_a, kappa_a, beta_a = (pred_c[:, 0], pred_c[:, 1], pred_c[:, 2],
                                              pred_c[:, 3], pred_c[:, 4])
    Qa = radians_to_Q(psi_a, alpha_a, eta_a)
    ga1, ga2, ga3 = Qa[:, :, 0], Qa[:, :, 1], Qa[:, :, 2]
    Ex_a, ExxT_a = _expected_moments(kappa_a, beta_a, Qa)
    log_c_a = _log_c(kappa_a, beta_a)
    aconst = jnp.sum(kappa_a[:, None] * ga1 * Ex_a, axis=-1)
    sA1 = beta_a * jnp.einsum('np,npq,nq->n', ga2, ExxT_a, ga2)
    sA2 = beta_a * jnp.einsum('np,npq,nq->n', ga3, ExxT_a, ga3)
    rowA = -log_c_a + aconst + sA1 - sA2
    fa = jnp.concatenate(
        [Ex_a, ExxT_a.reshape(-1, 9), rowA[:, None], jnp.ones_like(rowA)[:, None]], axis=1)

    # --- B side (target) ---
    eta_b, alpha_b, psi_b, kappa_b, beta_b = (tgt_c[:, 0], tgt_c[:, 1], tgt_c[:, 2],
                                              tgt_c[:, 3], tgt_c[:, 4])
    Qb = radians_to_Q(psi_b, alpha_b, eta_b)
    gb1, gb2, gb3 = Qb[:, :, 0], Qb[:, :, 1], Qb[:, :, 2]
    log_c_b = _log_c(kappa_b, beta_b)
    kbg1 = kappa_b[:, None] * gb1
    u1 = beta_b[:, None, None] * gb2[:, :, None] * gb2[:, None, :]   # beta_b g2 g2^T
    u2 = beta_b[:, None, None] * gb3[:, :, None] * gb3[:, None, :]   # beta_b g3 g3^T
    fb = jnp.concatenate(
        [-kbg1, (u2 - u1).reshape(-1, 9),
         jnp.ones_like(log_c_b)[:, None], log_c_b[:, None]], axis=1)
    return fa.astype(jnp.float32), fb.astype(jnp.float32)


def kent_loss(kent_pred, kent_target, const=1.0):
    pred_c = soft_clamp_kent_dist(kent_pred)
    tgt_c = soft_clamp_kent_dist(kent_target)
    fa, fb = _kent_features(pred_c, tgt_c)
    na, nb = fa.shape[0], fb.shape[0]

    # Balanced adaptive output tiles: large enough to amortize per-step overhead and keep
    # stores lane-dense, small enough that padding never dominates and the double-buffered
    # tiles stay well inside the 32 MiB scoped VMEM limit on every TPU generation.
    tm = _choose_tile(na, 8, _TM_MAX)
    tn = _choose_tile(nb, 128, _TN_MAX)
    na_pad = _round_up(na, tm)
    nb_pad = _round_up(nb, tn)

    fa_pad = jnp.pad(fa, ((0, na_pad - na), (0, _K_PAD - _K_FEAT)))
    fbt_pad = jnp.pad(fb.T, ((0, _K_PAD - _K_FEAT), (0, nb_pad - nb)))

    loss_pad = _pairwise_kent_loss_pallas(fa_pad, fbt_pad, tm, tn, const)
    return loss_pad[:na, :nb]


class KentLoss:
    """JAX/Pallas port of sphdet KentLoss.forward (returns the (Na, Nb) loss matrix)."""

    def __init__(self, img_size, loss_weight=30.0):
        self.loss_weight = loss_weight   # unused in forward, mirroring the reference module
        self.img_size = img_size
        self._fwd = jax.jit(self._forward)

    def _forward(self, pred, target):
        img_h, img_w = self.img_size
        kent_target = deg2kent_single(target, img_h, img_w)
        kent_pred = deg2kent_single(pred, img_h, img_w)
        return kent_loss(kent_pred, kent_target)

    def __call__(self, pred, target, weight=None, avg_factor=None, reduction_override=None, **kw):
        return self._fwd(pred, target)


# ----------------------------------- demo -----------------------------------
if __name__ == "__main__":
    key = jax.random.PRNGKey(0)
    k_pred, k_tgt = jax.random.split(key)
    n_pred, n_tgt = 8, 6

    def make_boxes(k, n):
        ka, kb, kc, kd = jax.random.split(k, 4)
        cx = jax.random.uniform(ka, (n,), minval=-180.0, maxval=180.0)
        cy = jax.random.uniform(kb, (n,), minval=-80.0, maxval=80.0)
        fw = jax.random.uniform(kc, (n,), minval=10.0, maxval=60.0)
        fh = jax.random.uniform(kd, (n,), minval=10.0, maxval=60.0)
        return jnp.stack([cx, cy, fw, fh], axis=1).astype(jnp.float32)

    pred_boxes = make_boxes(k_pred, n_pred)      # (8, 4)
    target_boxes = make_boxes(k_tgt, n_tgt)      # (6, 4)

    loss_mod = KentLoss(img_size=(480, 960))
    out = loss_mod(pred_boxes, target_boxes)
    out = jax.block_until_ready(out)
    assert out.shape == (n_pred, n_tgt) and out.dtype == jnp.float32
    assert bool(jnp.all(jnp.isfinite(out)))
    assert bool(jnp.all((out >= 0.0) & (out <= 1.0)))
    print("KERNEL_OK")
</pallas_src>

<mosaic_0001>
module attributes {stable_mosaic.version = 11 : i64} {
  func.func @_kld_loss_kernel(%arg0: i32, %arg1: i32, %arg2: memref<8x16xf32, #tpu.memory_space<vmem>>, %arg3: memref<16x128xf32, #tpu.memory_space<vmem>>, %arg4: memref<8x128xf32, #tpu.memory_space<vmem>>) attributes {dimension_semantics = [#tpu.dimension_semantics<parallel>, #tpu.dimension_semantics<parallel>], iteration_bounds = array<i64: 1, 1>, scalar_prefetch = 0 : i64, scratch_operands = 0 : i64, tpu.core_type = #tpu.core_type<tc>, window_params = [{transform_indices = @transform_0, window_bounds = array<i64: 8, 16>}, {transform_indices = @transform_1, window_bounds = array<i64: 16, 128>}, {transform_indices = @transform_2, window_bounds = array<i64: 8, 128>}]} {
    %c0 = arith.constant 0 : index
    %c0_0 = arith.constant 0 : index
    %0 = vector.load %arg2[%c0, %c0_0] : memref<8x16xf32, #tpu.memory_space<vmem>>, vector<8x16xf32>
    %c0_1 = arith.constant 0 : index
    %c0_2 = arith.constant 0 : index
    %1 = vector.load %arg3[%c0_1, %c0_2] : memref<16x128xf32, #tpu.memory_space<vmem>>, vector<16x128xf32>
    %cst = arith.constant dense<0.000000e+00> : vector<8x128xf32>
    %2 = tpu.matmul %0, %1, %cst {dimension_numbers = #tpu.dot_dimension_numbers<[1], [0], [0], [1], [0, 0, 1, 1], [], []>} : vector<8x16xf32>, vector<16x128xf32>, vector<8x128xf32> -> vector<8x128xf32>
    %cst_3 = arith.constant 0.000000e+00 : f32
    %3 = vector.broadcast %cst_3 : f32 to vector<8x128xf32>
    %4 = arith.maximumf %2, %3 : vector<8x128xf32>
    %cst_4 = arith.constant 9.99999997E-7 : f32
    %5 = vector.broadcast %cst_4 : f32 to vector<8x128xf32>
    %6 = arith.addf %4, %5 : vector<8x128xf32>
    %7 = math.sqrt %6 : vector<8x128xf32>
    %cst_5 = arith.constant 1.000000e+00 : f32
    %8 = vector.broadcast %cst_5 : f32 to vector<8x128xf32>
    %9 = arith.addf %8, %7 : vector<8x128xf32>
    %10 = tpu.reciprocal %9 {approx = true} : vector<8x128xf32> -> vector<8x128xf32>
    %cst_6 = arith.constant 1.000000e+00 : f32
    %11 = vector.broadcast %cst_6 : f32 to vector<8x128xf32>
    %12 = arith.subf %11, %10 : vector<8x128xf32>
    %c0_7 = arith.constant 0 : index
    %c0_8 = arith.constant 0 : index
    %13 = vector.load %arg4[%c0_7, %c0_8] : memref<8x128xf32, #tpu.memory_space<vmem>>, vector<8x128xf32>
    tpu.vector_store %arg4[%c0_7, %c0_8], %12 {strides = array<i32>} : memref<8x128xf32, #tpu.memory_space<vmem>>, vector<8x128xf32>,
    return
  }
  func.func @transform_0(%arg0: i32, %arg1: i32) -> (i32, i32) {
    %c0_i32 = arith.constant 0 : i32
    %c0_i32_0 = arith.constant 0 : i32
    return %arg0, %c0_i32 : i32, i32
  }
  func.func @transform_1(%arg0: i32, %arg1: i32) -> (i32, i32) {
    %c0_i32 = arith.constant 0 : i32
    %c0_i32_0 = arith.constant 0 : i32
    return %c0_i32, %arg1 : i32, i32
  }
  func.func @transform_2(%arg0: i32, %arg1: i32) -> (i32, i32) {
    %c0_i32 = arith.constant 0 : i32
    return %arg0, %arg1 : i32, i32
  }
}

</mosaic_0001>

<bundles_post_ra>
// kernel: _forward.1
= control target key start
LH: loop header
LB: loop body
LE: loop exit
PB: predicated region body
PF: predicated region fallthrough
CT: control target
= control target key end

     0   :  { %v162_v2 = vmov 0.0|0.0   ;;  %vm163_vm0 = vmmov 0   ;;  %v164_v4 = vmov 0.0   ;;  %s202_s0 = inlined_call_operand.vmem [shape: f32[8,16], index: 0, kind: input, shape index: {}]   ;;  %s203_s1 = inlined_call_operand.vmem [shape: f32[16,128], index: 1, kind: input, shape index: {}]   ;;  %s204_s2 = inlined_call_operand.hbm [shape: f32[8,128], index: 2, kind: output, shape index: {}]  }
   0x1   :  { %v13_v0 = vld [vmem:[%s203_s1] sm:$0xff]  ;;  %v14_v1 = vld [vmem:[%s203_s1 + $0x8] sm:$0xff]  ;;  %127 = vmatprep.subr.bf16.mxu0 %v162_v2  ;;  %124 = vmatprep.mubr.msk.f32.mxu0 %vm163_vm0, %v164_v4 }
   0x2   :  { %v128_v3 = vpack.c.bf16 %v14_v1, %v13_v0 }
   0x3   :  { %7 = vsyncpa [#allocation3], 0  ;;  %v12_v5 = vld [vmem:[%s202_s0] sm:$0xff]  ;;  %vm15_vm1 = vcmask 130048   ;;  %s165_s1 = smov [#allocation2]  }
   0x4   :  { %129 = vmatpush3.bf16.msra.mxu0 %v128_v3  ;;  %s108_s15 = sshll.u32 %s165_s1, 4  ;;  %s109_s15 = int_to_ptr.vmem [resolvable:$true] %s108_s15 }
   0x5   :  { %s138_s0 = scalar_lea.vmem %s109_s15, 128  ;;  %p143_p1 = scmp.lt.s32.totalorder %s109_s15, %s109_s15 }
   0x6   :  { %p139_p0 = scmp.ne.s32.totalorder %s109_s15, %s138_s0  ;;  %p144_p2 = scmp.lt.s32.totalorder %s138_s0, %s138_s0 }
   0x7   :  { %125 = vmatmul.mubr.msk.f32.vlgmr.msra.gmra.mrb[0].mxu0 %vm15_vm1, %v12_v5 }
   0x8   :  { %p145_p3 = por %p144_p2, %p143_p1 }
   0xa   :  { %p146_p4 = pnand %p145_p3, %p139_p0 }
  0xda   :  { %v85_v6 = vpop.f32.mrb[0].mxu0 }
  0xdb   :  { %v89_v7 = vmax.f32 %v85_v6, 0.0  ;;  %v126_v8 = vpop.f32.mrb[1].mxu0 }
  0xdd   :  { %v90_v9 = vadd.f32 1e-06, %v89_v7 }
  0xdf   :  { %134 = vrsqrt.f32 %v90_v9  ;;  %vm93_vm2 = vcmp.eq.f32.partialorder %v90_v9, inf  ;;  %v96_v12 = vand.u32 2147483648, %v90_v9  ;;  %vm95_vm3 = vcmp.eq.f32.partialorder %v90_v9, 0.0 }
  0xe9   :  { %v135_v10 = vpop.eup %134 }
  0xea   :  { %v92_v11 = vmul.f32 %v135_v10, %v90_v9 }
  0xec   :  { %v94_v13 = vsel %vm93_vm2, %v90_v9, %v92_v11 }
  0xed   :  { %v97_v14 = vsel %vm95_vm3, %v96_v12, %v94_v13 }
  0xee   :  { %v98_v15 = vadd.f32 1.0, %v97_v14 }
  0xf0   :  { %136 = vrcp.f32 %v98_v15 }
  0xfa   :  { %v137_v16 = vpop.eup %136 }
  0xfb   :  { %v100_v17 = vsub.f32 1.0, %v137_v16 }
  0xfd   :  { %101 = vst [vmem:[#allocation2] sm:$0xff] %v100_v17 }
  0xfe   :  { %149 = shalt.err (!%p146_p4)
}
  0xff   :  { %s150_s18 = scalar_lea.hbm %s204_s2, 128 }
 0x100   :  { %p151_p5 = scmp.ne.s32.totalorder %s204_s2, %s150_s18  ;;  %p154_p6 = scmp.lt.u32.totalorder %s150_s18, %s204_s2 }
 0x102   :  { %p156_p7 = pnand %p154_p6, %p151_p5 }
 0x104   :  { %159 = shalt.err (!%p156_p7)
}
 0x105   :  { %111 = dma.vmem_to_hbm [thread:$0]  %s109_s15, 128, %s204_s2, [#allocation3]  }
 0x106   :  { %160 = dma.done.wait [#allocation3], 128  }
 0x107   :  { %161 = vsyncadd [#allocation3], 4294967168 }
 0x108   :  { %115 = vsyncpa [#allocation3], 1 }

</bundles_post_ra>
